<compile_context>
chip_gen: v5e
topology: v5e:2x2
jax: 0.10.0
libtpu: 0.0.40
codegen_flags: <defaults>
</compile_context>

<pallas_src>
import functools

import numpy as np
import jax
import jax.numpy as jnp
from jax.experimental import pallas as pl
from jax.experimental.pallas import tpu as pltpu


def _round_up(x, m):
    return ((x + m - 1) // m) * m


def _patch_embed_kernel(x_ref, w_ref, b_ref, o_ref):
    # x_ref: (tm, Kp) streaming patch-matrix tile (compute dtype, e.g. bf16)
    # w_ref: (Kp, Npad) VMEM-resident flattened conv weight (compute dtype)
    # b_ref: (1, Npad)  VMEM-resident f32 bias
    # o_ref: (tm, Npad) lane-dense output tile (out dtype)
    acc = jnp.dot(x_ref[...], w_ref[...], preferred_element_type=jnp.float32)
    o_ref[...] = (acc + b_ref[...]).astype(o_ref.dtype)


def pack_patch_embed_params(weight, bias, compute_dtype=jnp.bfloat16):
    """Flatten / transpose / zero-pad the Conv2d params once (hoist out of per-call path)."""
    dim, C, p, p2 = weight.shape
    assert p == p2
    K = C * p * p
    Kp = K if K % 128 == 0 else _round_up(K, 128)        # MXU/lane-aligned contraction
    Npad = _round_up(dim, 128)                           # lane-dense (unmasked) stores
    wt = weight.reshape(dim, K).T.astype(compute_dtype)  # (K, dim), (c, dy, dx) order
    wt = jnp.pad(wt, ((0, Kp - K), (0, Npad - dim)))
    b2 = jnp.pad(bias.astype(jnp.float32), (0, Npad - dim)).reshape(1, Npad)
    return wt, b2


def _choose_tm(M, Kp, Npad, in_item, out_item, block_m, vmem_budget_bytes):
    """Footprint-derived M tile: as large as VMEM allows, but keep >= ~8 grid steps."""
    SUB = 16  # bf16 sublane packing (multiple of the f32 requirement of 8)
    fixed = Kp * Npad * in_item + 2 * Npad * 4            # resident weight + bias buffers
    per_row = 2 * Kp * in_item + 2 * Npad * out_item      # double-buffered x / out tiles
    cap = max(SUB, (vmem_budget_bytes - fixed) // per_row)
    tgt = _round_up(pl.cdiv(M, 8), 256)                   # >= ~8 steps (v7x megacore + pipelining)
    tm = min(block_m, cap, tgt)
    tm = max(SUB, (tm // SUB) * SUB)
    if tm >= 256:
        tm = (tm // 256) * 256                            # MXU row granularity for big tiles
    if tm >= M:
        return M                                          # single full-dim tile (always legal)
    return tm


def patch_embedding(x, weight=None, bias=None, patch_size=None, batch_first=True,
                    compute_dtype=jnp.bfloat16, out_dtype=None, block_m=2048,
                    packed_params=None, dim=None):
    """x: (B, C, H, W) NCHW; weight: (dim, C, p, p); bias: (dim,).

    compute_dtype: dtype fed to the MXU (default bf16; f32 accumulation always).
    out_dtype:     output dtype (default x.dtype, i.e. f32 like the PyTorch conv).
    packed_params: optional (wt, b2) from pack_patch_embed_params (needs dim=).
    """
    assert patch_size is not None
    B, C, H, W = x.shape
    p = patch_size
    Hp, Wp = H // p, W // p
    num_patches = Hp * Wp

    cdt = jnp.dtype(compute_dtype)
    odt = jnp.dtype(out_dtype) if out_dtype is not None else jnp.dtype(x.dtype)

    if packed_params is None:
        dim = weight.shape[0]
        wt, b2 = pack_patch_embed_params(weight, bias, cdt)
    else:
        wt, b2 = packed_params
        assert dim is not None, "dim= required with packed_params"
        cdt = jnp.dtype(wt.dtype)
    Kp, Npad = wt.shape
    K = C * p * p
    assert Kp >= K and Npad >= dim

    # Drop trailing rows/cols not covered by a full patch (Conv2d VALID truncation).
    x = x[:, :, :Hp * p, :Wp * p]

    # ---- patchify (one XLA copy-fusion; materializes the (M, Kp) patch matrix) ----
    # Cast first so the materialized patch matrix is written in the narrow compute
    # dtype; the K zero-pad rides in the same fusion.  Feature order (c, dy, dx)
    # matches Conv2d's reduction order and pack_patch_embed_params.
    xp = x.astype(cdt).reshape(B, C, Hp, p, Wp, p)
    xp = xp.transpose(0, 2, 4, 1, 3, 5).reshape(B * num_patches, K)
    if Kp != K:
        xp = jnp.pad(xp, ((0, 0), (0, Kp - K)))
    M = B * num_patches

    in_item = np.dtype(cdt).itemsize
    out_item = np.dtype(odt).itemsize
    tm = _choose_tm(M, Kp, Npad, in_item, out_item, block_m,
                    vmem_budget_bytes=40 * 1024 * 1024)
    grid_m = pl.cdiv(M, tm)                               # ragged last tile handled by Pallas

    cost = pl.CostEstimate(
        flops=2 * M * Kp * Npad,
        transcendentals=0,
        bytes_accessed=(M * Kp + Kp * Npad) * in_item + Npad * 4 + M * Npad * out_item,
    )

    out = pl.pallas_call(
        _patch_embed_kernel,
        out_shape=jax.ShapeDtypeStruct((M, Npad), odt),
        grid=(grid_m,),
        in_specs=[
            pl.BlockSpec((tm, Kp), lambda i: (i, 0)),      # x tiles stream over M
            # Constant index_map -> weight/bias stay VMEM-resident (no re-DMA per step).
            # pl.Buffered(1) here would save one resident copy of the weight; see header.
            pl.BlockSpec((Kp, Npad), lambda i: (0, 0)),
            pl.BlockSpec((1, Npad), lambda i: (0, 0)),
        ],
        out_specs=pl.BlockSpec((tm, Npad), lambda i: (i, 0)),
        compiler_params=pltpu.CompilerParams(
            dimension_semantics=("parallel",),             # megacore split on v7x
            vmem_limit_bytes=48 * 1024 * 1024,             # headroom under 64 MiB v7x VMEM
        ),
        cost_estimate=cost,
    )(xp, wt, b2)

    # For 128-aligned dims (ViT 768/1024/1280) this slice is a no-op; for other dims
    # consider keeping the padded (M, Npad) layout flowing into the next op instead.
    out = out[:, :dim].reshape(B, num_patches, dim)
    if not batch_first:
        out = out.transpose(1, 0, 2)                       # ('SL', 'B', 'D')
    return out
    # TODO(synk): norm_layer is Identity by default; a LayerNorm variant would fuse as an
    # extra stage on the f32 accumulator before the output cast.


def _reference(x, weight, bias, patch_size):
    # Pure-JAX reference via conv_general_dilated (== PyTorch Conv2d, NCHW).
    y = jax.lax.conv_general_dilated(
        x, weight,
        window_strides=(patch_size, patch_size),
        padding="VALID",
        dimension_numbers=("NCHW", "OIHW", "NCHW"),
    ) + bias.reshape(1, -1, 1, 1)
    B, D, Hp, Wp = y.shape
    return y.reshape(B, D, Hp * Wp).transpose(0, 2, 1)


if __name__ == "__main__":
    # Small, module-consistent shapes: img 16x16, patch 4, in_channels 4, dim 32
    B, C, H, W = 2, 4, 16, 16
    patch = 4
    dim = 32

    key = jax.random.PRNGKey(0)
    kx, kw, kb = jax.random.split(key, 3)
    x = jax.random.normal(kx, (B, C, H, W), dtype=jnp.float32)
    weight = jax.random.normal(kw, (dim, C, patch, patch), dtype=jnp.float32) * 0.05
    bias = jax.random.normal(kb, (dim,), dtype=jnp.float32) * 0.05

    ref = _reference(x, weight, bias, patch)
    n_patches = (H // patch) * (W // patch)

    # Exact-path check: f32 MXU inputs, f32 accumulation, f32 output.
    fn_f32 = jax.jit(functools.partial(patch_embedding, patch_size=patch,
                                       compute_dtype=jnp.float32))
    out_f32 = jax.block_until_ready(fn_f32(x, weight, bias))
    assert out_f32.shape == (B, n_patches, dim), out_f32.shape
    assert jnp.allclose(out_f32, ref, atol=1e-4, rtol=1e-4), \
        float(jnp.max(jnp.abs(out_f32 - ref)))

    # Production default: bf16 MXU inputs, f32 accumulation, f32 output.
    fn_bf16 = jax.jit(functools.partial(patch_embedding, patch_size=patch))
    out_bf16 = jax.block_until_ready(fn_bf16(x, weight, bias))
    assert out_bf16.shape == out_f32.shape
    assert jnp.allclose(out_bf16, ref, atol=5e-2, rtol=5e-2), \
        float(jnp.max(jnp.abs(out_bf16 - ref)))

    # Pre-packed params path (weight flatten/pad hoisted out of the per-call path).
    packed = jax.jit(pack_patch_embed_params)(weight, bias)
    fn_packed = jax.jit(functools.partial(patch_embedding, patch_size=patch, dim=dim))
    out_packed = jax.block_until_ready(fn_packed(x, packed_params=packed))
    assert jnp.allclose(out_packed, out_bf16, atol=1e-6, rtol=1e-6)

    print("KERNEL_OK")
</pallas_src>

<mosaic_0001>
module attributes {stable_mosaic.version = 11 : i64} {
  func.func @_patch_embed_kernel(%arg0: i32, %arg1: memref<32x128xf32, #tpu.memory_space<vmem>>, %arg2: memref<128x128xf32, #tpu.memory_space<vmem>>, %arg3: memref<1x128xf32, #tpu.memory_space<vmem>>, %arg4: memref<32x128xf32, #tpu.memory_space<vmem>>) attributes {dimension_semantics = [#tpu.dimension_semantics<parallel>], iteration_bounds = array<i64: 1>, scalar_prefetch = 0 : i64, scratch_operands = 0 : i64, tpu.core_type = #tpu.core_type<tc>, window_params = [{transform_indices = @transform_0, window_bounds = array<i64: 32, 128>}, {pipeline_mode = #tpu.pipeline_mode<synchronous>, transform_indices = @transform_1, window_bounds = array<i64: 128, 128>}, {pipeline_mode = #tpu.pipeline_mode<synchronous>, transform_indices = @transform_2, window_bounds = array<i64: 1, 128>}, {transform_indices = @transform_3, window_bounds = array<i64: 32, 128>}]} {
    %c0 = arith.constant 0 : index
    %c0_0 = arith.constant 0 : index
    %0 = vector.load %arg1[%c0, %c0_0] : memref<32x128xf32, #tpu.memory_space<vmem>>, vector<32x128xf32>
    %c0_1 = arith.constant 0 : index
    %c0_2 = arith.constant 0 : index
    %1 = vector.load %arg2[%c0_1, %c0_2] : memref<128x128xf32, #tpu.memory_space<vmem>>, vector<128x128xf32>
    %cst = arith.constant dense<0.000000e+00> : vector<32x128xf32>
    %2 = tpu.matmul %0, %1, %cst {dimension_numbers = #tpu.dot_dimension_numbers<[1], [0], [0], [1], [0, 0, 1, 1], [], []>} : vector<32x128xf32>, vector<128x128xf32>, vector<32x128xf32> -> vector<32x128xf32>
    %c0_3 = arith.constant 0 : index
    %c0_4 = arith.constant 0 : index
    %3 = vector.load %arg3[%c0_3, %c0_4] : memref<1x128xf32, #tpu.memory_space<vmem>>, vector<1x128xf32>
    %4 = vector.broadcast %3 : vector<1x128xf32> to vector<32x128xf32>
    %5 = arith.addf %2, %4 : vector<32x128xf32>
    %c0_5 = arith.constant 0 : index
    %c0_6 = arith.constant 0 : index
    %6 = vector.load %arg4[%c0_5, %c0_6] : memref<32x128xf32, #tpu.memory_space<vmem>>, vector<32x128xf32>
    tpu.vector_store %arg4[%c0_5, %c0_6], %5 {strides = array<i32>} : memref<32x128xf32, #tpu.memory_space<vmem>>, vector<32x128xf32>,
    return
  }
  func.func @transform_0(%arg0: i32) -> (i32, i32) {
    %c0_i32 = arith.constant 0 : i32
    %c0_i32_0 = arith.constant 0 : i32
    return %arg0, %c0_i32 : i32, i32
  }
  func.func @transform_1(%arg0: i32) -> (i32, i32) {
    %c0_i32 = arith.constant 0 : i32
    %c0_i32_0 = arith.constant 0 : i32
    %c0_i32_1 = arith.constant 0 : i32
    return %c0_i32, %c0_i32_0 : i32, i32
  }
  func.func @transform_2(%arg0: i32) -> (i32, i32) {
    %c0_i32 = arith.constant 0 : i32
    %c0_i32_0 = arith.constant 0 : i32
    %c0_i32_1 = arith.constant 0 : i32
    return %c0_i32, %c0_i32_0 : i32, i32
  }
  func.func @transform_3(%arg0: i32) -> (i32, i32) {
    %c0_i32 = arith.constant 0 : i32
    %c0_i32_0 = arith.constant 0 : i32
    return %arg0, %c0_i32 : i32, i32
  }
}

</mosaic_0001>

<bundles_post_ra>
// kernel: patch_embedding.1
= control target key start
LH: loop header
LB: loop body
LE: loop exit
PB: predicated region body
PF: predicated region fallthrough
CT: control target
= control target key end

     0   :  { %s257_s0 = inlined_call_operand.vmem [shape: f32[32,128], index: 0, kind: input, shape index: {}]   ;;  %s258_s1 = inlined_call_operand.vmem [shape: f32[128,128], index: 1, kind: input, shape index: {}]   ;;  %s259_s2 = inlined_call_operand.vmem [shape: f32[1,128], index: 2, kind: input, shape index: {}]   ;;  %s260_s3 = inlined_call_operand.hbm [shape: f32[32,128], index: 3, kind: output, shape index: {}]  }
   0x1   :  { %v34_v0 = vld [vmem:[%s258_s1 + $0x78] sm:$0xff]  ;;  %v33_v1 = vld [vmem:[%s258_s1 + $0x70] sm:$0xff]  ;;  %v32_v2 = vld [vmem:[%s258_s1 + $0x68] sm:$0xff] }
   0x2   :  { %91 = vmatpush.msra.mxu2 %v34_v0  ;;  %92 = vmatpush.msra.mxu3 %v34_v0  ;;  %v31_v3 = vld [vmem:[%s258_s1 + $0x60] sm:$0xff]  ;;  %v30_v4 = vld [vmem:[%s258_s1 + $0x58] sm:$0xff] }
   0x3   :  { %39 = vmatpush.msra.mxu0 %v34_v0  ;;  %90 = vmatpush.msra.mxu1 %v34_v0 }
   0x4   :  { %94 = vmatpush.msra.mxu2 %v33_v1  ;;  %95 = vmatpush.msra.mxu3 %v33_v1 }
   0x5   :  { %40 = vmatpush.msra.mxu0 %v33_v1  ;;  %93 = vmatpush.msra.mxu1 %v33_v1 }
   0x6   :  { %97 = vmatpush.msra.mxu2 %v32_v2  ;;  %98 = vmatpush.msra.mxu3 %v32_v2 }
   0x7   :  { %41 = vmatpush.msra.mxu0 %v32_v2  ;;  %96 = vmatpush.msra.mxu1 %v32_v2 }
   0x8   :  { %100 = vmatpush.msra.mxu2 %v31_v3  ;;  %101 = vmatpush.msra.mxu3 %v31_v3 }
   0x9   :  { %8 = vsyncpa [#allocation3], 0  ;;  %v29_v5 = vld [vmem:[%s258_s1 + $0x50] sm:$0xff]  ;;  %42 = vmatpush.msra.mxu0 %v31_v3  ;;  %99 = vmatpush.msra.mxu1 %v31_v3  ;;  %v28_v6 = vld [vmem:[%s258_s1 + $0x48] sm:$0xff]  ;;  %s168_s26 = smov [#allocation2]   ;;  %s170_s30 = smov 8  }
   0xa   :  { %103 = vmatpush.msra.mxu2 %v30_v4  ;;  %104 = vmatpush.msra.mxu3 %v30_v4  ;;  %v27_v7 = vld [vmem:[%s258_s1 + $0x40] sm:$0xff]  ;;  %v26_v8 = vld [vmem:[%s258_s1 + $0x38] sm:$0xff]  ;;  %v25_v9 = vld [vmem:[%s258_s1 + $0x30] sm:$0xff]  ;;  %s76_s27 = sshll.u32 %s168_s26, 4  ;;  %s77_s27 = int_to_ptr.vmem [resolvable:$true] %s76_s27 }
   0xb   :  { %43 = vmatpush.msra.mxu0 %v30_v4  ;;  %102 = vmatpush.msra.mxu1 %v30_v4  ;;  %v24_v10 = vld [vmem:[%s258_s1 + $0x28] sm:$0xff]  ;;  %v23_v11 = vld [vmem:[%s258_s1 + $0x20] sm:$0xff]  ;;  %v22_v12 = vld [vmem:[%s258_s1 + $0x18] sm:$0xff] }
   0xc   :  { %106 = vmatpush.msra.mxu2 %v29_v5  ;;  %107 = vmatpush.msra.mxu3 %v29_v5  ;;  %v21_v13 = vld [vmem:[%s258_s1 + $0x10] sm:$0xff]  ;;  %v20_v14 = vld [vmem:[%s258_s1 + $0x8] sm:$0xff]  ;;  %v19_v15 = vld [vmem:[%s258_s1] sm:$0xff] }
   0xd   :  { %44 = vmatpush.msra.mxu0 %v29_v5  ;;  %105 = vmatpush.msra.mxu1 %v29_v5  ;;  %v17_v16 = vld [vmem:[%s257_s0 + $0x10] sm:$0xff]  ;;  %v18_v17 = vld [vmem:[%s257_s0 + $0x18] sm:$0xff]  ;;  %v15_v18 = vld [vmem:[%s257_s0] sm:$0xff] }
   0xe   :  { %109 = vmatpush.msra.mxu2 %v28_v6  ;;  %110 = vmatpush.msra.mxu3 %v28_v6  ;;  %v16_v19 = vld [vmem:[%s257_s0 + $0x8] sm:$0xff]  ;;  %v141_v20 = vld [vmem:[%s259_s2] ss:$0 sm:$0xff]  ;;  %s78_s0 = sshll.u32 %s260_s3, 4  ;;  %s169_s2 = smov 128   ;;  %s79_s0 = int_to_ptr.hbm [resolvable:$true] %s78_s0 }
   0xf   :  { %45 = vmatpush.msra.mxu0 %v28_v6  ;;  %108 = vmatpush.msra.mxu1 %v28_v6 }
  0x10   :  { %112 = vmatpush.msra.mxu2 %v27_v7  ;;  %113 = vmatpush.msra.mxu3 %v27_v7 }
  0x11   :  { %46 = vmatpush.msra.mxu0 %v27_v7  ;;  %111 = vmatpush.msra.mxu1 %v27_v7 }
  0x12   :  { %115 = vmatpush.msra.mxu2 %v26_v8  ;;  %116 = vmatpush.msra.mxu3 %v26_v8 }
  0x13   :  { %47 = vmatpush.msra.mxu0 %v26_v8  ;;  %114 = vmatpush.msra.mxu1 %v26_v8 }
  0x14   :  { %118 = vmatpush.msra.mxu2 %v25_v9  ;;  %119 = vmatpush.msra.mxu3 %v25_v9 }
  0x15   :  { %48 = vmatpush.msra.mxu0 %v25_v9  ;;  %117 = vmatpush.msra.mxu1 %v25_v9 }
  0x16   :  { %121 = vmatpush.msra.mxu2 %v24_v10  ;;  %122 = vmatpush.msra.mxu3 %v24_v10 }
  0x17   :  { %49 = vmatpush.msra.mxu0 %v24_v10  ;;  %120 = vmatpush.msra.mxu1 %v24_v10 }
  0x18   :  { %124 = vmatpush.msra.mxu2 %v23_v11  ;;  %125 = vmatpush.msra.mxu3 %v23_v11 }
  0x19   :  { %50 = vmatpush.msra.mxu0 %v23_v11  ;;  %123 = vmatpush.msra.mxu1 %v23_v11 }
  0x1a   :  { %127 = vmatpush.msra.mxu2 %v22_v12  ;;  %128 = vmatpush.msra.mxu3 %v22_v12 }
  0x1b   :  { %51 = vmatpush.msra.mxu0 %v22_v12  ;;  %126 = vmatpush.msra.mxu1 %v22_v12 }
  0x1c   :  { %130 = vmatpush.msra.mxu2 %v21_v13  ;;  %131 = vmatpush.msra.mxu3 %v21_v13 }
  0x1d   :  { %52 = vmatpush.msra.mxu0 %v21_v13  ;;  %129 = vmatpush.msra.mxu1 %v21_v13 }
  0x1e   :  { %133 = vmatpush.msra.mxu2 %v20_v14  ;;  %134 = vmatpush.msra.mxu3 %v20_v14 }
  0x1f   :  { %53 = vmatpush.msra.mxu0 %v20_v14  ;;  %132 = vmatpush.msra.mxu1 %v20_v14 }
  0x20   :  { %136 = vmatpush.msra.mxu2 %v19_v15  ;;  %137 = vmatpush.msra.mxu3 %v19_v15 }
  0x21   :  { %61 = vmatmul.f32.vlgmr.msra.gmra.mxu2 %v17_v16  ;;  %64 = vmatmul.f32.vlgmr.msra.gmra.mxu3 %v18_v17 }
  0x22   :  { %54 = vmatpush.msra.mxu0 %v19_v15  ;;  %135 = vmatpush.msra.mxu1 %v19_v15 }
  0x23   :  { %55 = vmatmul.f32.vlgmr.msra.gmra.mxu0 %v15_v18  ;;  %58 = vmatmul.f32.vlgmr.msra.gmra.mxu1 %v16_v19 }
  0xa0   :  { %v56_v21 = vpop.f32.mrf.mxu0  ;;  %v59_v22 = vpop.f32.mrf.mxu1 }
  0xa1   :  { %v57_v23 = vadd.f32 %v141_v20, %v56_v21  ;;  %v60_v24 = vadd.f32 %v141_v20, %v59_v22 }
  0xa3   :  { %68 = vst [vmem:[#allocation2] sm:$0xff] %v57_v23 }
  0xa4   :  { %69 = vst [vmem:[#allocation2 + $0x8] sm:$0xff] %v60_v24  ;;  %v62_v25 = vpop.f32.mrf.mxu2  ;;  %v65_v26 = vpop.f32.mrf.mxu3 }
  0xa5   :  { %v63_v27 = vadd.f32 %v141_v20, %v62_v25  ;;  %v66_v28 = vadd.f32 %v141_v20, %v65_v26 }
  0xa7   :  { %70 = vst [vmem:[#allocation2 + $0x10] sm:$0xff] %v63_v27 }
  0xa8   :  { %71 = vst [vmem:[#allocation2 + $0x18] sm:$0xff] %v66_v28 }
  0xa9   :  { %84 = dma.vmem_to_hbm [thread:$0]  %s77_s27, 512, %s79_s0, [#allocation3], %s169_s2, %s169_s2, %s170_s30  }
  0xaa   :  { %166 = dma.done.wait [#allocation3], 512  }
  0xab   :  { %167 = vsyncadd [#allocation3], 4294966784 }
  0xac   :  { %89 = vsyncpa [#allocation3], 1 }

</bundles_post_ra>
